<compile_context>
chip_gen: v5e
topology: v5e:2x2
jax: 0.10.0
libtpu: 0.0.40
codegen_flags: <defaults>
</compile_context>

<pallas_src>
import functools

import jax
import jax.numpy as jnp
from jax.experimental import pallas as pl
from jax.experimental.pallas import tpu as pltpu

LANE = 128


def _round_up(n: int, m: int) -> int:
    return (n + m - 1) // m * m


def reinforce_kernel(x_ref, w1_ref, w2_ref, o_ref):
    # x_ref : [TB, obs_dim]        bf16, batch tile
    # w1_ref: [obs_dim, hid_p]     bf16, = W1^T zero-padded on hidden cols (resident)
    # w2_ref: [hid_p, action_dim]  bf16, = W2^T zero-padded on hidden rows (resident)
    # o_ref : [TB, action_dim]     f32 probabilities (no lane padding)

    # Linear 1 (no bias) + ReLU  -- bf16 operands, f32 accumulation on the MXU.
    h = jnp.dot(x_ref[...], w1_ref[...], preferred_element_type=jnp.float32)
    h = jnp.maximum(h, 0.0).astype(w2_ref.dtype)  # back to bf16 for the 2nd MXU pass

    # Linear 2 (no bias). Padded hidden rows of W2^T are zero, and the padded
    # hidden cols of h are relu(0)=0, so they contribute exactly 0.
    logits = jnp.dot(h, w2_ref[...], preferred_element_type=jnp.float32)

    # Numerically-stable softmax along the last dim, f32, exact division.
    m = jnp.max(logits, axis=-1, keepdims=True)
    e = jnp.exp(logits - m)
    denom = jnp.sum(e, axis=-1, keepdims=True)
    o_ref[...] = (e / denom).astype(o_ref.dtype)


@functools.partial(jax.jit, static_argnames=("tb",))
def reinforce_forward(x, w1, w2, *, tb: int = 1024):
    """x: [B, obs_dim]; w1: [hidden, obs_dim]; w2: [action_dim, hidden].

    Returns softmax action probabilities [B, action_dim] (dtype of x).
    """
    B, obs_dim = x.shape
    hidden_dim, _ = w1.shape
    action_dim, _ = w2.shape

    # Only the hidden dim is lane-padded (weights are tiny & VMEM-resident).
    hid_p = _round_up(hidden_dim, LANE)

    # Batch tile: sublane-aligned, never larger than the (padded) batch.
    tb_eff = min(_round_up(tb, 8), _round_up(B, 8))
    b_p = _round_up(B, tb_eff)

    # Pre-transposed, hidden-padded bf16 weights (tiny; folded by XLA under jit).
    w1_t = jnp.zeros((obs_dim, hid_p), jnp.bfloat16).at[:, :hidden_dim].set(
        w1.T.astype(jnp.bfloat16)
    )
    w2_t = jnp.zeros((hid_p, action_dim), jnp.bfloat16).at[:hidden_dim, :].set(
        w2.T.astype(jnp.bfloat16)
    )

    # bf16 activations; pad only the batch dim (and only if needed). Padded
    # zero rows just produce a uniform softmax that is sliced off.
    x_b = x.astype(jnp.bfloat16)
    if b_p != B:
        x_b = jnp.zeros((b_p, obs_dim), jnp.bfloat16).at[:B].set(x_b)

    grid = (b_p // tb_eff,)

    out = pl.pallas_call(
        reinforce_kernel,
        out_shape=jax.ShapeDtypeStruct((b_p, action_dim), jnp.float32),
        grid_spec=pltpu.PrefetchScalarGridSpec(
            num_scalar_prefetch=0,
            grid=grid,
            in_specs=[
                # Batch-tiled x; last block dim == full obs_dim (legal, unpadded).
                pl.BlockSpec((tb_eff, obs_dim), lambda i: (i, 0)),
                # Resident weights (constant index_map -> no re-DMA per step).
                pl.BlockSpec((obs_dim, hid_p), lambda i: (0, 0)),
                pl.BlockSpec((hid_p, action_dim), lambda i: (0, 0)),
            ],
            # Unpadded output: last block dim == full action_dim.
            out_specs=pl.BlockSpec((tb_eff, action_dim), lambda i: (i, 0)),
        ),
        compiler_params=pltpu.CompilerParams(
            # Batch axis is embarrassingly parallel -> shard across TCs on v7x.
            dimension_semantics=("parallel",),
        ),
    )(x_b, w1_t, w2_t)

    if b_p != B:
        out = out[:B]
    return out.astype(x.dtype)


def reference_forward(x, w1, w2):
    h = jnp.maximum(x @ w1.T, 0.0)
    logits = h @ w2.T
    return jax.nn.softmax(logits, axis=-1)


if __name__ == "__main__":
    # CartPole-like feature sizes (obs_dim=4, action_dim=2, hidden_dim=100 as in
    # the PyTorch default). Small batch, with tb chosen so the grid has 2 steps
    # to exercise the batch tiling.
    obs_dim, action_dim, hidden_dim = 4, 2, 100
    B, TB = 64, 32

    key = jax.random.PRNGKey(0)
    kx, k1, k2 = jax.random.split(key, 3)

    x = jax.random.normal(kx, (B, obs_dim), dtype=jnp.float32)
    # Kaiming-uniform-ish init matching nn.Linear shape conventions.
    bound1 = 1.0 / jnp.sqrt(jnp.float32(obs_dim))
    bound2 = 1.0 / jnp.sqrt(jnp.float32(hidden_dim))
    w1 = jax.random.uniform(k1, (hidden_dim, obs_dim), jnp.float32, -bound1, bound1)
    w2 = jax.random.uniform(k2, (action_dim, hidden_dim), jnp.float32, -bound2, bound2)

    out = reinforce_forward(x, w1, w2, tb=TB)
    out = jax.block_until_ready(out)

    ref = reference_forward(x, w1, w2)
    assert out.shape == (B, action_dim)
    # Tolerance accounts for bf16 matmul operands (f32 accumulation / epilogue).
    assert jnp.allclose(out, ref, atol=2e-2, rtol=2e-2), "mismatch vs. JAX reference"
    # Exact division -> probabilities sum to ~1 per row to f32 rounding.
    assert jnp.allclose(jnp.sum(out, axis=-1), 1.0, atol=1e-5)

    print("KERNEL_OK")
</pallas_src>

<mosaic_0001>
module attributes {stable_mosaic.version = 11 : i64} {
  func.func @reinforce_kernel(%arg0: i32, %arg1: memref<32x4xbf16, #tpu.memory_space<vmem>>, %arg2: memref<4x128xbf16, #tpu.memory_space<vmem>>, %arg3: memref<128x2xbf16, #tpu.memory_space<vmem>>, %arg4: memref<32x2xf32, #tpu.memory_space<vmem>>) attributes {dimension_semantics = [#tpu.dimension_semantics<parallel>], iteration_bounds = array<i64: 2>, scalar_prefetch = 0 : i64, scratch_operands = 0 : i64, tpu.core_type = #tpu.core_type<tc>, window_params = [{transform_indices = @transform_0, window_bounds = array<i64: 32, 4>}, {pipeline_mode = #tpu.pipeline_mode<synchronous>, transform_indices = @transform_1, window_bounds = array<i64: 4, 128>}, {pipeline_mode = #tpu.pipeline_mode<synchronous>, transform_indices = @transform_2, window_bounds = array<i64: 128, 2>}, {transform_indices = @transform_3, window_bounds = array<i64: 32, 2>}]} {
    %c0 = arith.constant 0 : index
    %c0_0 = arith.constant 0 : index
    %0 = vector.load %arg1[%c0, %c0_0] : memref<32x4xbf16, #tpu.memory_space<vmem>>, vector<32x4xbf16>
    %c0_1 = arith.constant 0 : index
    %c0_2 = arith.constant 0 : index
    %1 = vector.load %arg2[%c0_1, %c0_2] : memref<4x128xbf16, #tpu.memory_space<vmem>>, vector<4x128xbf16>
    %cst = arith.constant dense<0.000000e+00> : vector<32x128xf32>
    %2 = tpu.matmul %0, %1, %cst {dimension_numbers = #tpu.dot_dimension_numbers<[1], [0], [0], [1], [0, 0, 1, 1], [], []>} : vector<32x4xbf16>, vector<4x128xbf16>, vector<32x128xf32> -> vector<32x128xf32>
    %cst_3 = arith.constant 0.000000e+00 : f32
    %3 = vector.broadcast %cst_3 : f32 to vector<32x128xf32>
    %4 = arith.maximumf %2, %3 : vector<32x128xf32>
    %5 = arith.truncf %4 : vector<32x128xf32> to vector<32x128xbf16>
    %c0_4 = arith.constant 0 : index
    %c0_5 = arith.constant 0 : index
    %6 = vector.load %arg3[%c0_4, %c0_5] : memref<128x2xbf16, #tpu.memory_space<vmem>>, vector<128x2xbf16>
    %cst_6 = arith.constant dense<0.000000e+00> : vector<32x2xf32>
    %7 = tpu.matmul %5, %6, %cst_6 {dimension_numbers = #tpu.dot_dimension_numbers<[1], [0], [0], [1], [0, 0, 1, 1], [], []>} : vector<32x128xbf16>, vector<128x2xbf16>, vector<32x2xf32> -> vector<32x2xf32>
    %cst_7 = arith.constant dense<0xFF800000> : vector<32xf32>
    %8 = vector.multi_reduction <maximumf>, %7, %cst_7 [1] : vector<32x2xf32> to vector<32xf32>
    %9 = vector.shape_cast %8 : vector<32xf32> to vector<32x1xf32>
    %10 = vector.broadcast %9 : vector<32x1xf32> to vector<32x2xf32>
    %11 = arith.subf %7, %10 : vector<32x2xf32>
    %12 = math.exp %11 : vector<32x2xf32>
    %cst_8 = arith.constant dense<0.000000e+00> : vector<32xf32>
    %13 = vector.multi_reduction <add>, %12, %cst_8 [1] : vector<32x2xf32> to vector<32xf32>
    %14 = vector.shape_cast %13 : vector<32xf32> to vector<32x1xf32>
    %15 = vector.broadcast %14 : vector<32x1xf32> to vector<32x2xf32>
    %16 = arith.divf %12, %15 : vector<32x2xf32>
    %c0_9 = arith.constant 0 : index
    %c0_10 = arith.constant 0 : index
    %17 = vector.load %arg4[%c0_9, %c0_10] : memref<32x2xf32, #tpu.memory_space<vmem>>, vector<32x2xf32>
    tpu.vector_store %arg4[%c0_9, %c0_10], %16 {strides = array<i32>} : memref<32x2xf32, #tpu.memory_space<vmem>>, vector<32x2xf32>,
    return
  }
  func.func @transform_0(%arg0: i32) -> (i32, i32) {
    %c0_i32 = arith.constant 0 : i32
    %c0_i32_0 = arith.constant 0 : i32
    return %arg0, %c0_i32 : i32, i32
  }
  func.func @transform_1(%arg0: i32) -> (i32, i32) {
    %c0_i32 = arith.constant 0 : i32
    %c0_i32_0 = arith.constant 0 : i32
    %c0_i32_1 = arith.constant 0 : i32
    return %c0_i32, %c0_i32_0 : i32, i32
  }
  func.func @transform_2(%arg0: i32) -> (i32, i32) {
    %c0_i32 = arith.constant 0 : i32
    %c0_i32_0 = arith.constant 0 : i32
    %c0_i32_1 = arith.constant 0 : i32
    return %c0_i32, %c0_i32_0 : i32, i32
  }
  func.func @transform_3(%arg0: i32) -> (i32, i32) {
    %c0_i32 = arith.constant 0 : i32
    %c0_i32_0 = arith.constant 0 : i32
    return %arg0, %c0_i32 : i32, i32
  }
}

</mosaic_0001>

<bundles_post_ra>
// kernel: reinforce_forward.1
= control target key start
LH: loop header
LB: loop body
LE: loop exit
PB: predicated region body
PF: predicated region fallthrough
CT: control target
= control target key end

     0   :  { %s589_s12 = smov 0   ;;  %s663_s0 = inlined_call_operand.vmem [shape: bf16[64,4], index: 0, kind: input, shape index: {}]   ;;  %s664_s1 = inlined_call_operand.vmem [shape: bf16[4,128], index: 1, kind: input, shape index: {}]   ;;  %s665_s2 = inlined_call_operand.vmem [shape: bf16[128,2], index: 2, kind: input, shape index: {}]   ;;  %s666_s3 = inlined_call_operand.vmem [shape: f32[64,2], index: 3, kind: output, shape index: {}]  }
   0x1 LB: > { %s466_s13 = sadd.s32 4294967295, %s567_s12   ;;  %p470_p0 = scmp.ge.s32.totalorder %s567_s12, 1  ;;  %s567_s12 = sphi %s589_s12, %s13_s12  }
   0x2   : > { %p138_p1 = scmp.lt.s32.totalorder %s567_s12, 3 }
   0x4   : > { %p139_p2 = pnand %p470_p0, %p138_p1 }
   0x5   : > { %s471_s16 = sshll.u32 (!%p139_p2), %s466_s13, 2 }
   0x6   : > { %142 = sbr.rel (%p139_p2) target bundleno = 576 (0x240), region = 32  ;;  %p163_p3 = scmp.lt.s32.totalorder (!%p139_p2), %s471_s16, 7 }
   0xb   : > { %v179_v0 = vld [vmem:[%s664_s1] sm:$0x3]  ;;  %vm197_vm0 = vcmask 1041408   ;;  %v528_v1 = vld [vmem:[%s665_s2 + $0x38] sm:$0xff]  ;;  %v527_v3 = vld [vmem:[%s665_s2 + $0x30] sm:$0xff]  ;;  %s668_s16 = smov (!%p163_p3, %s471_s16), 7 }
   0xc   : > { %v199_v2 = vsel %vm197_vm0, %v179_v0, 0  ;;  %290 = vmatpush.bf16.msra.mxu1 %v528_v1  ;;  %529 = vmatpush.bf16.msra.mxu2 %v528_v1  ;;  %s472_s21 = sshll.u32 %s668_s16, 2  ;;  %vm190_vm1 = vcmask 31744   ;;  %v526_v4 = vld [vmem:[%s665_s2 + $0x28] sm:$0xff]  ;;  %v525_v6 = vld [vmem:[%s665_s2 + $0x20] sm:$0xff]  ;;  %v524_v7 = vld [vmem:[%s665_s2 + $0x18] sm:$0xff] }
   0xd   : > { %208 = vmatpush.bf16.msra.mxu0 %v199_v2  ;;  %s166_s24 = scalar_lea.vmem %s663_s0, %s472_s21  ;;  %v523_v9 = vld [vmem:[%s665_s2 + $0x10] sm:$0xff]  ;;  %v522_v10 = vld [vmem:[%s665_s2 + $0x8] sm:$0xff]  ;;  %v521_v11 = vld [vmem:[%s665_s2] sm:$0xff]  ;;  %vm309_vm2 = vcmask 15360   ;;  %s474_s10 = sshll.u32 %s668_s16, 3 }
   0xe   : > { %v519_v5 = vld [vmem:[%s166_s24] sm:$0xff]  ;;  %v520_v8 = vld [vmem:[%s166_s24 + $0x8] sm:$0xff]  ;;  %s648_s14 = scalar_lea.vmem %s666_s3, %s474_s10 }
  0x10   : > { %291 = vmatpush.bf16.msra.mxu1 %v527_v3  ;;  %530 = vmatpush.bf16.msra.mxu2 %v527_v3 }
  0x11   : > { %483 = vmatmul.msk.bf16.vlgmr.msra.gmra.mxu0 %vm190_vm1, %v519_v5 }
  0x14   : > { %292 = vmatpush.bf16.msra.mxu1 %v526_v4  ;;  %531 = vmatpush.bf16.msra.mxu2 %v526_v4 }
  0x18   : > { %293 = vmatpush.bf16.msra.mxu1 %v525_v6  ;;  %532 = vmatpush.bf16.msra.mxu2 %v525_v6 }
  0x1c   : > { %294 = vmatpush.bf16.msra.mxu1 %v524_v7  ;;  %533 = vmatpush.bf16.msra.mxu2 %v524_v7 }
  0x20   : > { %295 = vmatpush.bf16.msra.mxu1 %v523_v9  ;;  %534 = vmatpush.bf16.msra.mxu2 %v523_v9 }
  0x21   : > { %484 = vmatmul.msk.bf16.gmra.mxu0 %vm190_vm1, %v520_v8 }
  0x24   : > { %296 = vmatpush.bf16.msra.mxu1 %v522_v10  ;;  %535 = vmatpush.bf16.msra.mxu2 %v522_v10 }
  0x28   : > { %297 = vmatpush.bf16.msra.mxu1 %v521_v11  ;;  %536 = vmatpush.bf16.msra.mxu2 %v521_v11 }
  0x8e   : > { %v210_v12 = vpop.f32.mrf.mxu0 }
  0x8f   : > { %v220_v14 = vmax.f32 %v210_v12, 0.0 }
  0x96   : > { %v212_v13 = vpop.f32.mrf.mxu0 }
  0x97   : > { %v221_v15 = vmax.f32 %v212_v13, 0.0 }
  0x99   : > { %v224_v16 = vpack.c.bf16 %v221_v15, %v220_v14 }
  0x9b   : > { %298 = vmatmul.bf16.vlgmr.msra.gmra.mxu1 %v224_v16 }
  0x9e   : > { %v215_v17 = vpop.f32.mrf.mxu0 }
  0x9f   : > { %v222_v19 = vmax.f32 %v215_v17, 0.0 }
  0xa6   : > { %v217_v18 = vpop.f32.mrf.mxu0 }
  0xa7   : > { %v223_v20 = vmax.f32 %v217_v18, 0.0 }
  0xa9   : > { %v225_v21 = vpack.c.bf16 %v223_v20, %v222_v19 }
  0xab   : > { %303 = vmatmul.bf16.vlgmr.msra.gmra.mxu2 %v225_v21 }
 0x118   : > { %v299_v22 = vpop.f32.mrf.mxu1 }
 0x119   : > { %v310_v23 = vsel %vm309_vm2, %v299_v22, -inf }
 0x11a   : > { %311 = vmax.xlane.f32.xlu0 %v310_v23 }
 0x120   : > { %v301_v24 = vpop.f32.mrf.mxu1 }
 0x121   : > { %v313_v25 = vsel %vm309_vm2, %v301_v24, -inf }
 0x122   : > { %314 = vmax.xlane.f32.xlu0 %v313_v25 }
 0x12e   : > { %v304_v26 = vpop.f32.mrf.mxu2 }
 0x12f   : > { %v316_v27 = vsel %vm309_vm2, %v304_v26, -inf }
 0x130   : > { %317 = vmax.xlane.f32.xlu1 %v316_v27 }
 0x136   : > { %v306_v28 = vpop.f32.mrf.mxu2 }
 0x137   : > { %v319_v29 = vsel %vm309_vm2, %v306_v28, -inf }
 0x138   : > { %320 = vmax.xlane.f32.xlu1 %v319_v29 }
 0x18d   : > { %v312_v30 = vpop.xlane.xlu0 %311 }
 0x18e   : > { %v322_v31 = vsub.f32 %v299_v22, %v312_v30 }
 0x190   : > { %v326_v32 = vmul.f32 1.442695, %v322_v31 }
 0x192   : > { %545 = vpow2.f32 %v326_v32 }
 0x195   : > { %v315_v33 = vpop.xlane.xlu0 %314 }
 0x196   : > { %v323_v34 = vsub.f32 %v301_v24, %v315_v33 }
 0x198   : > { %v546_v35 = vpop.eup %545  ;;  %v328_v36 = vmul.f32 1.442695, %v323_v34 }
 0x199   : > { %v334_v37 = vsel %vm309_vm2, %v546_v35, 0.0 }
 0x19a   : > { %547 = vpow2.f32 %v328_v36  ;;  %335 = vadd.xlane.f32.xlu2 %v334_v37 }
 0x1a0   : > { %v548_v38 = vpop.eup %547 }
 0x1a1   : > { %v337_v39 = vsel %vm309_vm2, %v548_v38, 0.0 }
 0x1a2   : > { %338 = vadd.xlane.f32.xlu2 %v337_v39 }
 0x1a3   : > { %v318_v40 = vpop.xlane.xlu1 %317 }
 0x1a4   : > { %v324_v41 = vsub.f32 %v304_v26, %v318_v40 }
 0x1a6   : > { %v330_v42 = vmul.f32 1.442695, %v324_v41 }
 0x1a8   : > { %549 = vpow2.f32 %v330_v42 }
 0x1ab   : > { %v321_v43 = vpop.xlane.xlu1 %320 }
 0x1ac   : > { %v325_v44 = vsub.f32 %v306_v28, %v321_v43 }
 0x1ae   : > { %v636_v45 = vpop.eup %549  ;;  %v332_v46 = vmul.f32 1.442695, %v325_v44 }
 0x1af   : > { %v340_v47 = vsel %vm309_vm2, %v636_v45, 0.0 }
 0x1b0   : > { %551 = vpow2.f32 %v332_v46  ;;  %341 = vadd.xlane.f32.xlu0 %v340_v47 }
 0x1b6   : > { %v640_v48 = vpop.eup %551 }
 0x1b7   : > { %v343_v49 = vsel %vm309_vm2, %v640_v48, 0.0 }
 0x1b8   : > { %344 = vadd.xlane.f32.xlu1 %v343_v49 }
 0x20d   : > { %v336_v50 = vpop.xlane.xlu2 %335 }
 0x20e   : > { %553 = vrcp.f32 %v336_v50  ;;  %v357_v55 = vand.u32 2147483648, %v336_v50  ;;  %v355_v57 = vand.u32 2147483647, %v336_v50  ;;  %vm351_vm4 = vweird.f32 %v336_v50 }
 0x210   : > { %v358_v60 = vor.u32 1.1754944e-38, %v357_v55  ;;  %vm356_vm6 = vcmp.eq.f32.partialorder %v355_v57, 8.507059e+37 }
 0x214   : > { %v554_v51 = vpop.eup %553 }
 0x215   : > { %v347_v52 = vmul.f32 %v554_v51, %v336_v50  ;;  %v339_v53 = vpop.xlane.xlu2 %338  ;;  %vm352_vm3 = vweird.f32 %v554_v51 }
 0x216   : > { %555 = vrcp.f32 %v339_v53  ;;  %vm353_vm5 = vmor %vm351_vm4, %vm352_vm3  ;;  %v372_v2 = vand.u32 2147483648, %v339_v53  ;;  %v370_v4 = vand.u32 2147483647, %v339_v53  ;;  %vm366_vm8 = vweird.f32 %v339_v53 }
 0x217   : > { %v348_v54 = vsub.f32 1.0, %v347_v52 }
 0x218   : > { %v373_v7 = vor.u32 1.1754944e-38, %v372_v2  ;;  %vm371_vm10 = vcmp.eq.f32.partialorder %v370_v4, 8.507059e+37 }
 0x219   : > { %v349_v56 = vmul.f32 %v554_v51, %v348_v54 }
 0x21b   : > { %v350_v58 = vadd.f32 %v554_v51, %v349_v56 }
 0x21c   : > { %v556_v59 = vpop.eup %555 }
 0x21d   : > { %v354_v61 = vsel %vm353_vm5, %v554_v51, %v350_v58  ;;  %v362_v62 = vmul.f32 %v556_v59, %v339_v53  ;;  %vm367_vm7 = vweird.f32 %v556_v59 }
 0x21e   : > { %v359_v63 = vsel %vm356_vm6, %v358_v60, %v354_v61  ;;  %vm368_vm9 = vmor %vm366_vm8, %vm367_vm7 }
 0x21f   : > { %v360_v0 = vmul.f32 %v546_v35, %v359_v63  ;;  %v363_v1 = vsub.f32 1.0, %v362_v62 }
 0x221   : > { %406 = vst.msk [vmem:[%s648_s14] sm:$0xff] %vm309_vm2, %v360_v0  ;;  %v364_v3 = vmul.f32 %v556_v59, %v363_v1 }
 0x223   : > { %v365_v5 = vadd.f32 %v556_v59, %v364_v3  ;;  %v342_v6 = vpop.xlane.xlu0 %341 }
 0x224   : > { %557 = vrcp.f32 %v342_v6  ;;  %v387_v15 = vand.u32 2147483648, %v342_v6  ;;  %v385_v17 = vand.u32 2147483647, %v342_v6  ;;  %vm381_vm12 = vweird.f32 %v342_v6 }
 0x225   : > { %v369_v8 = vsel %vm368_vm9, %v556_v59, %v365_v5 }
 0x226   : > { %v374_v9 = vsel %vm371_vm10, %v373_v7, %v369_v8  ;;  %v388_v20 = vor.u32 1.1754944e-38, %v387_v15  ;;  %vm386_vm14 = vcmp.eq.f32.partialorder %v385_v17, 8.507059e+37 }
 0x227   : > { %v375_v10 = vmul.f32 %v548_v38, %v374_v9 }
 0x229   : > { %407 = vst.msk [vmem:[%s648_s14 + $0x8] sm:$0xff] %vm309_vm2, %v375_v10 }
 0x22a   : > { %v558_v11 = vpop.eup %557 }
 0x22b   : > { %v377_v12 = vmul.f32 %v558_v11, %v342_v6  ;;  %v345_v13 = vpop.xlane.xlu1 %344  ;;  %vm382_vm11 = vweird.f32 %v558_v11 }
 0x22c   : > { %559 = vrcp.f32 %v345_v13  ;;  %vm383_vm13 = vmor %vm381_vm12, %vm382_vm11  ;;  %v402_v26 = vand.u32 2147483648, %v345_v13  ;;  %v400_v28 = vand.u32 2147483647, %v345_v13  ;;  %vm396_vm0 = vweird.f32 %v345_v13 }
 0x22d   : > { %v378_v14 = vsub.f32 1.0, %v377_v12 }
 0x22e   : > { %v403_v30 = vor.u32 1.1754944e-38, %v402_v26  ;;  %vm401_vm3 = vcmp.eq.f32.partialorder %v400_v28, 8.507059e+37 }
 0x22f   : > { %v379_v16 = vmul.f32 %v558_v11, %v378_v14 }
 0x231   : > { %v380_v18 = vadd.f32 %v558_v11, %v379_v16 }
 0x232   : > { %v560_v19 = vpop.eup %559 }
 0x233   : > { %v384_v21 = vsel %vm383_vm13, %v558_v11, %v380_v18  ;;  %v392_v22 = vmul.f32 %v560_v19, %v345_v13  ;;  %vm397_vm15 = vweird.f32 %v560_v19 }
 0x234   : > { %v389_v23 = vsel %vm386_vm14, %v388_v20, %v384_v21  ;;  %vm398_vm1 = vmor %vm396_vm0, %vm397_vm15 }
 0x235   : > { %v390_v24 = vmul.f32 %v636_v45, %v389_v23  ;;  %v393_v25 = vsub.f32 1.0, %v392_v22 }
 0x237   : > { %408 = vst.msk [vmem:[%s648_s14 + $0x10] sm:$0xff] %vm309_vm2, %v390_v24  ;;  %v394_v27 = vmul.f32 %v560_v19, %v393_v25 }
 0x239   : > { %v395_v29 = vadd.f32 %v560_v19, %v394_v27 }
 0x23b   : > { %v399_v31 = vsel %vm398_vm1, %v560_v19, %v395_v29 }
 0x23c   : > { %v404_v32 = vsel %vm401_vm3, %v403_v30, %v399_v31 }
 0x23d   : > { %v405_v33 = vmul.f32 %v640_v48, %v404_v32 }
 0x23f   : > { %409 = vst.msk [vmem:[%s648_s14 + $0x18] sm:$0xff] %vm309_vm2, %v405_v33 }
 0x240 PF: > { %s13_s12 = sadd.s32 1, %s567_s12  }
 0x241   : > { %p10_p4 = scmp.ge.s32.totalorder %s13_s12, 4  }
 0x243   :  { %12 = sbr.rel (!%p10_p4) target bundleno = 1 (0x1), region = 62 }

</bundles_post_ra>
